<compile_context>
chip_gen: v7x
topology: tpu7x:2x2x1
jax: 0.10.0
libtpu: 0.0.40
codegen_flags: <defaults>
</compile_context>

<pallas_src>
import math

import jax
import jax.numpy as jnp
import numpy as np
from jax import lax
from jax.experimental import pallas as pl
from jax.experimental.pallas import tpu as pltpu

# ---------------------------------------------------------------------------
# Config (mirrors the PyTorch module's config)
# ---------------------------------------------------------------------------
BATCH = 2
SEQ = 8
HIDDEN = 32
NUM_HEADS = 4
HEAD_DIM = HIDDEN // NUM_HEADS
DROPOUT_PROB = 0.1            # eval mode -> identity
BS = BATCH * SEQ
FUSED_COLS = 2 * HIDDEN + NUM_HEADS * HIDDEN   # [Q | K | xWvo_0..xWvo_{nh-1}]
NEG_BIG = -1e30               # additive mask; exp underflows to exactly 0 in f32


def mha_kernel(x_ref, mask_ref, w_ref, o_ref):
    """Single invocation over the whole problem.

    x_ref    : (BS, H)             VMEM  activations, batch+seq flattened
    mask_ref : (BS, S)   f32       VMEM  user mask rows (nonzero = keep)
    w_ref    : (H, 2H + nh*H) f32  VMEM  fused [Wq.T*scale | Wk.T | Wvo blocks]
    o_ref    : (BS, H)             VMEM
    """
    x = x_ref[...]

    # ---- one fused MXU projection: Q, K and the Wo-folded V path ----------
    proj = jnp.dot(x, w_ref[...], preferred_element_type=jnp.float32)  # (BS, 192)

    # ---- block-diagonal additive mask bias, built in-kernel (VPU only) ----
    row_i = lax.broadcasted_iota(jnp.int32, (BS, BS), 0)
    col_i = lax.broadcasted_iota(jnp.int32, (BS, BS), 1)
    if SEQ & (SEQ - 1) == 0:                       # power-of-two seq: shift
        sh = SEQ.bit_length() - 1
        same_batch = (row_i >> sh) == (col_i >> sh)
    else:
        same_batch = (row_i // SEQ) == (col_i // SEQ)
    # column j of the (BS, BS) score matrix corresponds to s_j = j mod S:
    m_tiled = jnp.concatenate([mask_ref[...]] * BATCH, axis=1)          # (BS, BS)
    keep = same_batch & (m_tiled != 0.0)
    bias = jnp.where(keep, jnp.float32(0.0), jnp.float32(NEG_BIG))

    head_outs = []
    for h in range(NUM_HEADS):  # static unroll; independent chains interleave
        q_h = proj[:, h * HEAD_DIM:(h + 1) * HEAD_DIM]                   # scaled Q
        k_h = proj[:, HIDDEN + h * HEAD_DIM:HIDDEN + (h + 1) * HEAD_DIM]
        xwvo_h = proj[:, 2 * HIDDEN + h * HIDDEN:2 * HIDDEN + (h + 1) * HIDDEN]

        # q @ k^T, NT dot_general (flash-attention idiom: native transposed-RHS
        # MXU matmul, no materialized k transpose).
        scores = lax.dot_general(
            q_h, k_h, (((1,), (1,)), ((), ())),
            preferred_element_type=jnp.float32) + bias                   # (BS, BS)

        # Numerically-stable softmax; masked entries underflow to exactly 0.
        m = jnp.max(scores, axis=-1, keepdims=True)
        e = jnp.exp(scores - m)
        denom = jnp.sum(e, axis=-1, keepdims=True)
        r = pl.reciprocal(denom, approx=True)        # EUP slot (free-ish)
        r = r * (2.0 - denom * r)                    # 1 Newton step -> full precision

        # Wo already folded into xwvo_h: (BS,BS)@(BS,H) -> 32-lane-dense output,
        # normalize after the matmul (cheaper, (BS,H) mul vs (BS,BS)).
        head_outs.append(
            jnp.dot(e, xwvo_h, preferred_element_type=jnp.float32) * r)

    # Balanced tree-sum of head contributions (free VPU filler).
    while len(head_outs) > 1:
        nxt = [head_outs[i] + head_outs[i + 1]
               for i in range(0, len(head_outs) - 1, 2)]
        if len(head_outs) % 2:
            nxt.append(head_outs[-1])
        head_outs = nxt

    # TODO(synk): dropout (p=DROPOUT_PROB) omitted -- eval-mode identity.
    o_ref[...] = head_outs[0].astype(o_ref.dtype)


def prepare_weights(wq, wk, wv, wo):
    """One-time weight fusion (call ONCE, outside the per-call hot path).

    Returns (H, 2H + nh*H):
      cols [0, H)        : Wq.T * 1/sqrt(head_dim)
      cols [H, 2H)       : Wk.T
      cols [2H + h*H, ..): Wvo_h = Wv_h.T @ Wo_h.T   (Wo folded into V path)
    """
    scale = 1.0 / math.sqrt(HEAD_DIM)
    w_qk = jnp.concatenate([wq.T * scale, wk.T], axis=1)                 # (H, 2H)
    blocks = []
    for h in range(NUM_HEADS):
        wv_h = wv[h * HEAD_DIM:(h + 1) * HEAD_DIM, :]                    # (hd, H)
        wo_h = wo[:, h * HEAD_DIM:(h + 1) * HEAD_DIM]                    # (H, hd)
        blocks.append(wv_h.T @ wo_h.T)                                   # (H, H)
    w_vo = jnp.concatenate(blocks, axis=1)                               # (H, nh*H)
    return jnp.concatenate([w_qk, w_vo], axis=1).astype(jnp.float32)     # (H, 192)


@jax.jit
def multi_head_attention_fast(x, mask, w_fused):
    """Per-call hot path: two trivial reshapes + one pallas_call."""
    B, S, H = x.shape
    bs = B * S
    x2d = x.reshape(bs, H)
    mask2d = mask[:, 0].reshape(bs, S).astype(jnp.float32)   # tiny (BS, S)

    grid_spec = pltpu.PrefetchScalarGridSpec(
        num_scalar_prefetch=0,
        grid=(1,),   # single step: total live data is a few KiB
        in_specs=[
            pl.BlockSpec((bs, H), lambda i: (0, 0)),
            pl.BlockSpec((bs, S), lambda i: (0, 0)),
            pl.BlockSpec((H, FUSED_COLS), lambda i: (0, 0)),
        ],
        out_specs=pl.BlockSpec((bs, H), lambda i: (0, 0)),
    )
    out2d = pl.pallas_call(
        mha_kernel,
        out_shape=jax.ShapeDtypeStruct((bs, H), jnp.float32),
        grid_spec=grid_spec,
        compiler_params=pltpu.CompilerParams(
            dimension_semantics=("arbitrary",)),
    )(x2d, mask2d, w_fused)
    return out2d.reshape(B, S, H)


def reference(x, mask, wq, wk, wv, wo):
    """Pure-JAX reference mirroring the PyTorch forward (self-attention, eval)."""
    B, S, H = x.shape

    def split_heads(t):  # (B,S,H) -> (B,nh,S,hd)
        return t.reshape(B, S, NUM_HEADS, HEAD_DIM).transpose(0, 2, 1, 3)

    q = split_heads(x @ wq.T)
    k = split_heads(x @ wk.T).transpose(0, 1, 3, 2)      # (B,nh,hd,S)
    v = split_heads(x @ wv.T)
    scores = (q @ k) / math.sqrt(HEAD_DIM)               # (B,nh,S,S)
    scores = jnp.where(mask == 0, -jnp.inf, scores)
    w = jax.nn.softmax(scores, axis=-1)
    out = (w @ v).transpose(0, 2, 1, 3).reshape(B, S, H)
    return out @ wo.T


if __name__ == "__main__":
    key = jax.random.PRNGKey(0)
    kx, kq, kk, kv, ko = jax.random.split(key, 5)

    x = jax.random.normal(kx, (BATCH, SEQ, HIDDEN), dtype=jnp.float32)

    # torch.nn.Linear default init: U(-1/sqrt(in), 1/sqrt(in)); weights are
    # (out_features, in_features).
    bound = 1.0 / math.sqrt(HIDDEN)
    wq = jax.random.uniform(kq, (HIDDEN, HIDDEN), jnp.float32, -bound, bound)
    wk = jax.random.uniform(kk, (HIDDEN, HIDDEN), jnp.float32, -bound, bound)
    wv = jax.random.uniform(kv, (HIDDEN, HIDDEN), jnp.float32, -bound, bound)
    wo = jax.random.uniform(ko, (HIDDEN, HIDDEN), jnp.float32, -bound, bound)

    # Causal mask, shape (B, 1, S, S), 1 = keep, 0 = masked.
    causal = jnp.tril(jnp.ones((SEQ, SEQ), dtype=jnp.float32))
    mask = jnp.broadcast_to(causal, (BATCH, 1, SEQ, SEQ))

    # One-time weight fusion, hoisted out of the per-call hot path.
    w_fused = jax.block_until_ready(prepare_weights(wq, wk, wv, wo))

    out = multi_head_attention_fast(x, mask, w_fused)
    out = jax.block_until_ready(out)

    ref = reference(x, mask, wq, wk, wv, wo)
    np.testing.assert_allclose(np.asarray(out), np.asarray(ref),
                               rtol=1e-4, atol=1e-4)
    print("KERNEL_OK")
</pallas_src>

<mosaic_0001>
module attributes {stable_mosaic.version = 11 : i64} {
  func.func @mha_kernel(%arg0: i32, %arg1: memref<16x32xf32, #tpu.memory_space<vmem>>, %arg2: memref<16x8xf32, #tpu.memory_space<vmem>>, %arg3: memref<32x192xf32, #tpu.memory_space<vmem>>, %arg4: memref<16x32xf32, #tpu.memory_space<vmem>>) attributes {dimension_semantics = [#tpu.dimension_semantics<arbitrary>], iteration_bounds = array<i64: 1>, scalar_prefetch = 0 : i64, scratch_operands = 0 : i64, tpu.core_type = #tpu.core_type<tc>, window_params = [{pipeline_mode = #tpu.pipeline_mode<synchronous>, transform_indices = @transform_0, window_bounds = array<i64: 16, 32>}, {pipeline_mode = #tpu.pipeline_mode<synchronous>, transform_indices = @transform_1, window_bounds = array<i64: 16, 8>}, {pipeline_mode = #tpu.pipeline_mode<synchronous>, transform_indices = @transform_2, window_bounds = array<i64: 32, 192>}, {pipeline_mode = #tpu.pipeline_mode<synchronous>, transform_indices = @transform_3, window_bounds = array<i64: 16, 32>}]} {
    %c0 = arith.constant 0 : index
    %c0_0 = arith.constant 0 : index
    %0 = vector.load %arg1[%c0, %c0_0] : memref<16x32xf32, #tpu.memory_space<vmem>>, vector<16x32xf32>
    %c0_1 = arith.constant 0 : index
    %c0_2 = arith.constant 0 : index
    %1 = vector.load %arg3[%c0_1, %c0_2] : memref<32x192xf32, #tpu.memory_space<vmem>>, vector<32x192xf32>
    %cst = arith.constant dense<0.000000e+00> : vector<16x192xf32>
    %2 = tpu.matmul %0, %1, %cst {dimension_numbers = #tpu.dot_dimension_numbers<[1], [0], [0], [1], [0, 0, 1, 1], [], []>} : vector<16x32xf32>, vector<32x192xf32>, vector<16x192xf32> -> vector<16x192xf32>
    %3 = tpu.iota {dimensions = array<i32: 0>} : vector<16x16xi32>
    %4 = tpu.iota {dimensions = array<i32: 1>} : vector<16x16xi32>
    %c3_i32 = arith.constant 3 : i32
    %5 = vector.broadcast %c3_i32 : i32 to vector<16x16xi32>
    %6 = arith.shrsi %3, %5 : vector<16x16xi32>
    %c3_i32_3 = arith.constant 3 : i32
    %7 = vector.broadcast %c3_i32_3 : i32 to vector<16x16xi32>
    %8 = arith.shrsi %4, %7 : vector<16x16xi32>
    %9 = arith.cmpi eq, %6, %8 : vector<16x16xi32>
    %c0_4 = arith.constant 0 : index
    %c0_5 = arith.constant 0 : index
    %10 = vector.load %arg2[%c0_4, %c0_5] : memref<16x8xf32, #tpu.memory_space<vmem>>, vector<16x8xf32>
    %11 = tpu.concatenate %10, %10 in 1 : vector<16x8xf32>, vector<16x8xf32> -> vector<16x16xf32>
    %cst_6 = arith.constant 0.000000e+00 : f32
    %12 = vector.broadcast %cst_6 : f32 to vector<16x16xf32>
    %13 = arith.cmpf one, %11, %12 : vector<16x16xf32>
    %14 = arith.andi %9, %13 : vector<16x16xi1>
    %cst_7 = arith.constant 0.000000e+00 : f32
    %cst_8 = arith.constant -1.000000e+30 : f32
    %15 = vector.broadcast %cst_7 : f32 to vector<16x16xf32>
    %16 = vector.broadcast %cst_8 : f32 to vector<16x16xf32>
    %17 = arith.select %14, %15, %16 : vector<16x16xi1>, vector<16x16xf32>
    %18 = vector.extract_strided_slice %2 {offsets = [0, 0], sizes = [16, 8], strides = [1, 1]} : vector<16x192xf32> to vector<16x8xf32>
    %19 = vector.extract_strided_slice %2 {offsets = [0, 32], sizes = [16, 8], strides = [1, 1]} : vector<16x192xf32> to vector<16x8xf32>
    %20 = vector.extract_strided_slice %2 {offsets = [0, 64], sizes = [16, 32], strides = [1, 1]} : vector<16x192xf32> to vector<16x32xf32>
    %cst_9 = arith.constant dense<0.000000e+00> : vector<16x16xf32>
    %21 = tpu.matmul %18, %19, %cst_9 {dimension_numbers = #tpu.dot_dimension_numbers<[1], [1], [0], [0], [0, 0, 1, 0], [], []>} : vector<16x8xf32>, vector<16x8xf32>, vector<16x16xf32> -> vector<16x16xf32>
    %22 = arith.addf %21, %17 : vector<16x16xf32>
    %cst_10 = arith.constant dense<0xFF800000> : vector<16xf32>
    %23 = vector.multi_reduction <maximumf>, %22, %cst_10 [1] : vector<16x16xf32> to vector<16xf32>
    %24 = vector.shape_cast %23 : vector<16xf32> to vector<16x1xf32>
    %25 = vector.broadcast %24 : vector<16x1xf32> to vector<16x16xf32>
    %26 = arith.subf %22, %25 : vector<16x16xf32>
    %27 = math.exp %26 : vector<16x16xf32>
    %cst_11 = arith.constant dense<0.000000e+00> : vector<16xf32>
    %28 = vector.multi_reduction <add>, %27, %cst_11 [1] : vector<16x16xf32> to vector<16xf32>
    %29 = vector.shape_cast %28 : vector<16xf32> to vector<16x1xf32>
    %30 = tpu.reciprocal %29 {approx = true} : vector<16x1xf32> -> vector<16x1xf32>
    %31 = arith.mulf %29, %30 : vector<16x1xf32>
    %cst_12 = arith.constant 2.000000e+00 : f32
    %32 = vector.broadcast %cst_12 : f32 to vector<16x1xf32>
    %33 = arith.subf %32, %31 : vector<16x1xf32>
    %34 = arith.mulf %30, %33 : vector<16x1xf32>
    %cst_13 = arith.constant dense<0.000000e+00> : vector<16x32xf32>
    %35 = tpu.matmul %27, %20, %cst_13 {dimension_numbers = #tpu.dot_dimension_numbers<[1], [0], [0], [1], [0, 0, 1, 1], [], []>} : vector<16x16xf32>, vector<16x32xf32>, vector<16x32xf32> -> vector<16x32xf32>
    %36 = vector.broadcast %34 : vector<16x1xf32> to vector<16x32xf32>
    %37 = arith.mulf %35, %36 : vector<16x32xf32>
    %38 = vector.extract_strided_slice %2 {offsets = [0, 8], sizes = [16, 8], strides = [1, 1]} : vector<16x192xf32> to vector<16x8xf32>
    %39 = vector.extract_strided_slice %2 {offsets = [0, 40], sizes = [16, 8], strides = [1, 1]} : vector<16x192xf32> to vector<16x8xf32>
    %40 = vector.extract_strided_slice %2 {offsets = [0, 96], sizes = [16, 32], strides = [1, 1]} : vector<16x192xf32> to vector<16x32xf32>
    %cst_14 = arith.constant dense<0.000000e+00> : vector<16x16xf32>
    %41 = tpu.matmul %38, %39, %cst_14 {dimension_numbers = #tpu.dot_dimension_numbers<[1], [1], [0], [0], [0, 0, 1, 0], [], []>} : vector<16x8xf32>, vector<16x8xf32>, vector<16x16xf32> -> vector<16x16xf32>
    %42 = arith.addf %41, %17 : vector<16x16xf32>
    %cst_15 = arith.constant dense<0xFF800000> : vector<16xf32>
    %43 = vector.multi_reduction <maximumf>, %42, %cst_15 [1] : vector<16x16xf32> to vector<16xf32>
    %44 = vector.shape_cast %43 : vector<16xf32> to vector<16x1xf32>
    %45 = vector.broadcast %44 : vector<16x1xf32> to vector<16x16xf32>
    %46 = arith.subf %42, %45 : vector<16x16xf32>
    %47 = math.exp %46 : vector<16x16xf32>
    %cst_16 = arith.constant dense<0.000000e+00> : vector<16xf32>
    %48 = vector.multi_reduction <add>, %47, %cst_16 [1] : vector<16x16xf32> to vector<16xf32>
    %49 = vector.shape_cast %48 : vector<16xf32> to vector<16x1xf32>
    %50 = tpu.reciprocal %49 {approx = true} : vector<16x1xf32> -> vector<16x1xf32>
    %51 = arith.mulf %49, %50 : vector<16x1xf32>
    %cst_17 = arith.constant 2.000000e+00 : f32
    %52 = vector.broadcast %cst_17 : f32 to vector<16x1xf32>
    %53 = arith.subf %52, %51 : vector<16x1xf32>
    %54 = arith.mulf %50, %53 : vector<16x1xf32>
    %cst_18 = arith.constant dense<0.000000e+00> : vector<16x32xf32>
    %55 = tpu.matmul %47, %40, %cst_18 {dimension_numbers = #tpu.dot_dimension_numbers<[1], [0], [0], [1], [0, 0, 1, 1], [], []>} : vector<16x16xf32>, vector<16x32xf32>, vector<16x32xf32> -> vector<16x32xf32>
    %56 = vector.broadcast %54 : vector<16x1xf32> to vector<16x32xf32>
    %57 = arith.mulf %55, %56 : vector<16x32xf32>
    %58 = vector.extract_strided_slice %2 {offsets = [0, 16], sizes = [16, 8], strides = [1, 1]} : vector<16x192xf32> to vector<16x8xf32>
    %59 = vector.extract_strided_slice %2 {offsets = [0, 48], sizes = [16, 8], strides = [1, 1]} : vector<16x192xf32> to vector<16x8xf32>
    %60 = vector.extract_strided_slice %2 {offsets = [0, 128], sizes = [16, 32], strides = [1, 1]} : vector<16x192xf32> to vector<16x32xf32>
    %cst_19 = arith.constant dense<0.000000e+00> : vector<16x16xf32>
    %61 = tpu.matmul %58, %59, %cst_19 {dimension_numbers = #tpu.dot_dimension_numbers<[1], [1], [0], [0], [0, 0, 1, 0], [], []>} : vector<16x8xf32>, vector<16x8xf32>, vector<16x16xf32> -> vector<16x16xf32>
    %62 = arith.addf %61, %17 : vector<16x16xf32>
    %cst_20 = arith.constant dense<0xFF800000> : vector<16xf32>
    %63 = vector.multi_reduction <maximumf>, %62, %cst_20 [1] : vector<16x16xf32> to vector<16xf32>
    %64 = vector.shape_cast %63 : vector<16xf32> to vector<16x1xf32>
    %65 = vector.broadcast %64 : vector<16x1xf32> to vector<16x16xf32>
    %66 = arith.subf %62, %65 : vector<16x16xf32>
    %67 = math.exp %66 : vector<16x16xf32>
    %cst_21 = arith.constant dense<0.000000e+00> : vector<16xf32>
    %68 = vector.multi_reduction <add>, %67, %cst_21 [1] : vector<16x16xf32> to vector<16xf32>
    %69 = vector.shape_cast %68 : vector<16xf32> to vector<16x1xf32>
    %70 = tpu.reciprocal %69 {approx = true} : vector<16x1xf32> -> vector<16x1xf32>
    %71 = arith.mulf %69, %70 : vector<16x1xf32>
    %cst_22 = arith.constant 2.000000e+00 : f32
    %72 = vector.broadcast %cst_22 : f32 to vector<16x1xf32>
    %73 = arith.subf %72, %71 : vector<16x1xf32>
    %74 = arith.mulf %70, %73 : vector<16x1xf32>
    %cst_23 = arith.constant dense<0.000000e+00> : vector<16x32xf32>
    %75 = tpu.matmul %67, %60, %cst_23 {dimension_numbers = #tpu.dot_dimension_numbers<[1], [0], [0], [1], [0, 0, 1, 1], [], []>} : vector<16x16xf32>, vector<16x32xf32>, vector<16x32xf32> -> vector<16x32xf32>
    %76 = vector.broadcast %74 : vector<16x1xf32> to vector<16x32xf32>
    %77 = arith.mulf %75, %76 : vector<16x32xf32>
    %78 = vector.extract_strided_slice %2 {offsets = [0, 24], sizes = [16, 8], strides = [1, 1]} : vector<16x192xf32> to vector<16x8xf32>
    %79 = vector.extract_strided_slice %2 {offsets = [0, 56], sizes = [16, 8], strides = [1, 1]} : vector<16x192xf32> to vector<16x8xf32>
    %80 = vector.extract_strided_slice %2 {offsets = [0, 160], sizes = [16, 32], strides = [1, 1]} : vector<16x192xf32> to vector<16x32xf32>
    %cst_24 = arith.constant dense<0.000000e+00> : vector<16x16xf32>
    %81 = tpu.matmul %78, %79, %cst_24 {dimension_numbers = #tpu.dot_dimension_numbers<[1], [1], [0], [0], [0, 0, 1, 0], [], []>} : vector<16x8xf32>, vector<16x8xf32>, vector<16x16xf32> -> vector<16x16xf32>
    %82 = arith.addf %81, %17 : vector<16x16xf32>
    %cst_25 = arith.constant dense<0xFF800000> : vector<16xf32>
    %83 = vector.multi_reduction <maximumf>, %82, %cst_25 [1] : vector<16x16xf32> to vector<16xf32>
    %84 = vector.shape_cast %83 : vector<16xf32> to vector<16x1xf32>
    %85 = vector.broadcast %84 : vector<16x1xf32> to vector<16x16xf32>
    %86 = arith.subf %82, %85 : vector<16x16xf32>
    %87 = math.exp %86 : vector<16x16xf32>
    %cst_26 = arith.constant dense<0.000000e+00> : vector<16xf32>
    %88 = vector.multi_reduction <add>, %87, %cst_26 [1] : vector<16x16xf32> to vector<16xf32>
    %89 = vector.shape_cast %88 : vector<16xf32> to vector<16x1xf32>
    %90 = tpu.reciprocal %89 {approx = true} : vector<16x1xf32> -> vector<16x1xf32>
    %91 = arith.mulf %89, %90 : vector<16x1xf32>
    %cst_27 = arith.constant 2.000000e+00 : f32
    %92 = vector.broadcast %cst_27 : f32 to vector<16x1xf32>
    %93 = arith.subf %92, %91 : vector<16x1xf32>
    %94 = arith.mulf %90, %93 : vector<16x1xf32>
    %cst_28 = arith.constant dense<0.000000e+00> : vector<16x32xf32>
    %95 = tpu.matmul %87, %80, %cst_28 {dimension_numbers = #tpu.dot_dimension_numbers<[1], [0], [0], [1], [0, 0, 1, 1], [], []>} : vector<16x16xf32>, vector<16x32xf32>, vector<16x32xf32> -> vector<16x32xf32>
    %96 = vector.broadcast %94 : vector<16x1xf32> to vector<16x32xf32>
    %97 = arith.mulf %95, %96 : vector<16x32xf32>
    %98 = arith.addf %37, %57 : vector<16x32xf32>
    %99 = arith.addf %77, %97 : vector<16x32xf32>
    %100 = arith.addf %98, %99 : vector<16x32xf32>
    %c0_29 = arith.constant 0 : index
    %c0_30 = arith.constant 0 : index
    %101 = vector.load %arg4[%c0_29, %c0_30] : memref<16x32xf32, #tpu.memory_space<vmem>>, vector<16x32xf32>
    tpu.vector_store %arg4[%c0_29, %c0_30], %100 {strides = array<i32>} : memref<16x32xf32, #tpu.memory_space<vmem>>, vector<16x32xf32>,
    return
  }
  func.func @transform_0(%arg0: i32) -> (i32, i32) {
    %c0_i32 = arith.constant 0 : i32
    %c0_i32_0 = arith.constant 0 : i32
    %c0_i32_1 = arith.constant 0 : i32
    return %c0_i32, %c0_i32_0 : i32, i32
  }
  func.func @transform_1(%arg0: i32) -> (i32, i32) {
    %c0_i32 = arith.constant 0 : i32
    %c0_i32_0 = arith.constant 0 : i32
    %c0_i32_1 = arith.constant 0 : i32
    return %c0_i32, %c0_i32_0 : i32, i32
  }
  func.func @transform_2(%arg0: i32) -> (i32, i32) {
    %c0_i32 = arith.constant 0 : i32
    %c0_i32_0 = arith.constant 0 : i32
    %c0_i32_1 = arith.constant 0 : i32
    return %c0_i32, %c0_i32_0 : i32, i32
  }
  func.func @transform_3(%arg0: i32) -> (i32, i32) {
    %c0_i32 = arith.constant 0 : i32
    %c0_i32_0 = arith.constant 0 : i32
    %c0_i32_1 = arith.constant 0 : i32
    return %c0_i32, %c0_i32_0 : i32, i32
  }
}

</mosaic_0001>

<bundles_post_ra>
// kernel: multi_head_attention_fast.1
= control target key start
LH: loop header
LB: loop body
LE: loop exit
PB: predicated region body
PF: predicated region fallthrough
CT: control target
= control target key end

     0   :  { %8 = vsyncpa [#allocation3], 0  ;;  %s1600_s0 = inlined_call_operand.hbm [shape: f32[16,32], index: 0, kind: input, shape index: {}]   ;;  %s1601_s1 = inlined_call_operand.hbm [shape: f32[16,8], index: 1, kind: input, shape index: {}]   ;;  %s1602_s2 = inlined_call_operand.hbm [shape: f32[32,192], index: 2, kind: input, shape index: {}]   ;;  %s1603_s3 = inlined_call_operand.hbm [shape: f32[16,32], index: 3, kind: output, shape index: {}]  }
   0x1   :  { %9 = vsyncpa [#allocation6], 0 }
   0x2   :  { %10 = vsyncpa [#allocation4], 0  ;;  %s1366_s12 = smov [#allocation5]   ;;  %s1367_s14 = smov [#allocation2]  }
   0x3   :  { %s28_s13 = sshll.u32 %s1366_s12, 4  ;;  %s16_s15 = sshll.u32 %s1367_s14, 4  ;;  %s29_s13 = int_to_ptr.vmem [resolvable:$true] %s28_s13  ;;  %s1405_s15 = int_to_ptr.vmem [resolvable:$true] %s16_s15 }
   0x4   :  { %s1272_s18 = scalar_lea.hbm %s1601_s1, 256 }
   0x5   :  { %p1273_p0 = scmp.ne.s32.totalorder %s1601_s1, %s1272_s18  ;;  %p1276_p1 = scmp.lt.u32.totalorder %s1272_s18, %s1601_s1 }
   0x7   :  { %p1278_p2 = pnand %p1276_p1, %p1273_p0 }
   0x9   :  { %1281 = shalt.err (!%p1278_p2)
}
   0xa   :  { %s1282_s23 = scalar_lea.vmem %s29_s13, 256  ;;  %p1287_p4 = scmp.lt.s32.totalorder %s29_s13, %s29_s13 }
   0xb   :  { %p1283_p3 = scmp.ne.s32.totalorder %s29_s13, %s1282_s23  ;;  %p1288_p5 = scmp.lt.s32.totalorder %s1282_s23, %s1282_s23 }
   0xd   :  { %p1289_p6 = por %p1288_p5, %p1287_p4 }
   0xf   :  { %p1290_p7 = pnand %p1289_p6, %p1283_p3 }
  0x11   :  { %1293 = shalt.err (!%p1290_p7)
}
  0x12   :  { %s1368_s24 = smov 128   ;;  %s1369_s25 = smov 8  }
  0x13   :  { %34 = dma.hbm_to_vmem [thread:$0]  %s1601_s1, 256, %s29_s13, [#allocation6], %s1368_s24, %s1368_s24, %s1369_s25  }
  0x14   :  { %s1294_s30 = scalar_lea.hbm %s1600_s0, 256 }
  0x15   :  { %p1295_p8 = scmp.ne.s32.totalorder %s1600_s0, %s1294_s30  ;;  %p1298_p9 = scmp.lt.u32.totalorder %s1294_s30, %s1600_s0 }
  0x17   :  { %p1300_p10 = pnand %p1298_p9, %p1295_p8 }
  0x19   :  { %1303 = shalt.err (!%p1300_p10)
}
  0x1a   :  { %s1304_s8 = scalar_lea.vmem %s1405_s15, 256  ;;  %p1309_p12 = scmp.lt.s32.totalorder %s1405_s15, %s1405_s15 }
  0x1b   :  { %p1305_p11 = scmp.ne.s32.totalorder %s1405_s15, %s1304_s8  ;;  %p1310_p13 = scmp.lt.s32.totalorder %s1304_s8, %s1304_s8 }
  0x1d   :  { %p1311_p0 = por %p1310_p13, %p1309_p12 }
  0x1f   :  { %p1312_p1 = pnand %p1311_p0, %p1305_p11 }
  0x21   :  { %1315 = shalt.err (!%p1312_p1)
}
  0x22   :  { %22 = dma.hbm_to_vmem [thread:$0]  %s1600_s0, 256, %s1405_s15, [#allocation3], %s1368_s24, %s1368_s24, %s1369_s25  }
  0x23   :  { %s1370_s10 = smov [#allocation7]   ;;  %s1316_s14 = scalar_lea.hbm %s1602_s2, 1024 }
  0x24   :  { %s40_s11 = sshll.u32 %s1370_s10, 4  ;;  %p1317_p2 = scmp.ne.s32.totalorder %s1602_s2, %s1316_s14  ;;  %s41_s11 = int_to_ptr.vmem [resolvable:$true] %s40_s11 }
  0x25   :  { %p1320_p3 = scmp.lt.u32.totalorder %s1316_s14, %s1602_s2 }
  0x27   :  { %p1322_p4 = pnand %p1320_p3, %p1317_p2 }
  0x29   :  { %1325 = shalt.err (!%p1322_p4)
}
  0x2a   :  { %s1326_s20 = scalar_lea.vmem %s41_s11, 1024  ;;  %p1331_p6 = scmp.lt.s32.totalorder %s41_s11, %s41_s11 }
  0x2b   :  { %p1327_p5 = scmp.ne.s32.totalorder %s41_s11, %s1326_s20  ;;  %p1332_p7 = scmp.lt.s32.totalorder %s1326_s20, %s1326_s20 }
  0x2d   :  { %p1333_p8 = por %p1332_p7, %p1331_p6 }
  0x2f   :  { %p1334_p9 = pnand %p1333_p8, %p1327_p5 }
  0x31   :  { %1337 = shalt.err (!%p1334_p9)
}
  0x32   :  { %s1371_s0 = smov 256   ;;  %s1372_s15 = smov 16  }
  0x33   :  { %46 = dma.hbm_to_vmem [thread:$0]  %s1602_s2, 1024, %s41_s11, [#allocation6], %s1371_s0, %s1371_s0, %s1372_s15  }
  0x34   :  { %1360 = dma.done.wait [#allocation3], 256  }
  0x35   :  { %1361 = vsyncadd [#allocation3], 4294967040 }
  0x36   :  { %1362 = dma.done.wait [#allocation6], 1280  }
  0x37   :  { %1363 = vsyncadd [#allocation6], 4294966016  ;;  %v1373_v0 = vmov 0.0   ;;  %v59_v1 = vld [vmem:[#allocation7 + $0x8] sm:$0xff]  ;;  %v61_v2 = vld [vmem:[#allocation7 + $0x18] sm:$0xff]  ;;  %vm66_vm0 = vcmask 261120   ;;  %v150_v41 = vlaneseq }
  0x38   :  { %137 = vmatprep.mubr.f32.mxu0 %v1373_v0  ;;  %v58_v3 = vld [vmem:[#allocation7] sm:$0xff]  ;;  %v1138_v4 = vpack.c.bf16 %v61_v2, %v59_v1  ;;  %v60_v5 = vld [vmem:[#allocation7 + $0x10] sm:$0xff]  ;;  %v63_v6 = vld [vmem:[#allocation7 + $0x28] sm:$0xff]  ;;  %vm170_vm1 = vcmask 64512   ;;  %s1374_s2 = smov 120   ;;  %s1375_s23 = smov 80  }
  0x39   :  { %v65_v7 = vld [vmem:[#allocation7 + $0x38] sm:$0xff]  ;;  %v1140_v8 = vpack.c.bf16 %v60_v5, %v58_v3  ;;  %v62_v10 = vld [vmem:[#allocation7 + $0x20] sm:$0xff]  ;;  %v64_v11 = vld [vmem:[#allocation7 + $0x30] sm:$0xff]  ;;  %s1376_s26 = smov 96   ;;  %s1377_s27 = smov 112   ;;  %v151_v42 = vshrl.u32 %v150_v41, 7 }
  0x3a   :  { %v1142_v9 = vpack.c.bf16 %v65_v7, %v63_v6  ;;  %1139 = vmatprep.subr.bf16.mxu0 %v1138_v4  ;;  %v1144_v12 = vpack.c.bf16 %v64_v11, %v62_v10  ;;  %v56_v13 = vld [vmem:[#allocation2] sm:$0xff]  ;;  %v57_v14 = vld [vmem:[#allocation2 + $0x8] sm:$0xff]  ;;  %s1378_s28 = smov 88   ;;  %v160_v22 = vld [vmem:[#allocation5] sm:$0xff]  ;;  %v154_v44 = vand.u32 127, %v150_v41  ;;  %vm268_vm8 = vcmask 130048  }
  0x3b   :  { %1141 = vmatpush1.bf16.msra.mxu0 %v1140_v8  ;;  %v161_v23 = vld [vmem:[#allocation5 + $0x8] sm:$0xff]  ;;  %vm1489_vm2 = vmpackc.low %vm170_vm1, %vm170_vm1  ;;  %v152_v43 = vadd.s32 8, %v151_v42  ;;  %v155_v50 = vshra.s32 %v151_v42, 3  ;;  %v1379_v52 = vmov -1e+30   ;;  %s1380_s29 = smov 32  }
  0x3c   :  { %1143 = vmatprep.subr.bf16.mxu0 %v1142_v9  ;;  %v157_v47 = vshra.s32 %v154_v44, 3  ;;  %s1381_s30 = smov 72   ;;  %s1382_s4 = smov 64  }
  0x3d   :  { %v156_v46 = vshra.s32 %v152_v43, 3  ;;  %s1383_s5 = smov 104   ;;  %s1384_s6 = smov [#allocation8]  }
  0x3e   :  { %vm158_vm6 = vcmp.eq.s32.totalorder %v155_v50, %v157_v47  ;;  %s1011_s7 = sshll.u32 %s1384_s6, 4  ;;  %s1012_s7 = int_to_ptr.vmem [resolvable:$true] %s1011_s7 }
  0x3f   :  { %1145 = vmatpush1.bf16.msra.mxu0 %v1144_v12  ;;  %vm159_vm3 = vcmp.eq.s32.totalorder %v156_v46, %v157_v47  ;;  %s1338_s8 = scalar_lea.vmem %s1012_s7, 256  ;;  %p1343_p11 = scmp.lt.s32.totalorder %s1012_s7, %s1012_s7 }
  0x40   :  { %p1339_p10 = scmp.ne.s32.totalorder %s1012_s7, %s1338_s8  ;;  %p1344_p12 = scmp.lt.s32.totalorder %s1338_s8, %s1338_s8 }
  0x42   :  { %1024 = vmatmul.mubr.msk.f32.vlgmr.msra.gmra.mrb[0].mxu0 %vm66_vm0, %v56_v13  ;;  %p1345_p13 = por %p1344_p12, %p1343_p11 }
  0x43   :  { %143 = vmatprep.mubr.f32.mxu0 %v1373_v0 }
  0x44   :  { %p1346_p0 = pnand %p1345_p13, %p1339_p10 }
  0x46   :  { %1025 = vmatmul.mubr.msk.f32.gmra.mrb[2].mxu0 %vm66_vm0, %v57_v14 }
 0x115   :  { %v1456_v15 = vpop.f32.mrb[0].mxu0 }
 0x116   :  { %384 = vrot.lane.b32.xlu1 %v1456_v15, %s1374_s2  ;;  %v1459_v16 = vpop.f32.mrb[1].mxu0  ;;  %1086 = vmatprep.mubr.msk.f32.mxu1 %vm170_vm1, %v1456_v15 }
 0x119   :  { %v1463_v17 = vpop.f32.mrb[2].mxu0 }
 0x11a   :  { %v1465_v18 = vpop.f32.mrb[3].mxu0  ;;  %v1469_v19 = vpack.i.bf16 %v1463_v17, %v1456_v15 }
 0x11b   :  { %v1235_v20 = vpack.i.bf16 %v1465_v18, %v1459_v16  ;;  %v1475_v21 = vpack.c.bf16 %v1465_v18, %v1459_v16 }
 0x11c   :  { %1216 = vrot.lane.b32.xlu1 %v1469_v19, %s1375_s23  ;;  %1206 = vrot.lane.b32.xlu0 %v1469_v19, %s1376_s26 }
 0x120   :  { %590 = vrot.lane.b32.xlu1 %v1456_v15, %s1377_s27  ;;  %1211 = vrot.lane.b32.xlu0 %v1469_v19, %s1378_s28 }
 0x124   :  { %386 = vrot.lane.b32.xlu0 %v1463_v17, %s1374_s2  ;;  %164 = vrot.lane.b32.xlu1 %v160_v22, %s1369_s25 }
 0x128   :  { %592 = vrot.lane.b32.xlu0 %v1463_v17, %s1377_s27 }
 0x12c   :  { %166 = vrot.lane.b32.xlu0 %v161_v23, %s1369_s25 }
 0x188   :  { %v385_v24 = vpop.permute.xlu1 %384 }
 0x189   :  { %1100 = vmatprep.mubr.msk.f32.mxu0 %vm170_vm1, %v385_v24 }
 0x18e   :  { %v1207_v25 = vpop.permute.xlu0 %1206  ;;  %v1217_v28 = vpop.permute.xlu1 %1216 }
 0x18f   :  { %v1209_v26 = vunpack.i.h.bf16 %v1207_v25  ;;  %v1208_v27 = vunpack.i.l.bf16 %v1207_v25  ;;  %v1219_v32 = vunpack.i.h.bf16 %v1217_v28  ;;  %v1218_v33 = vunpack.i.l.bf16 %v1217_v28 }
 0x191   :  { %v1146_v30 = vpack.c.bf16 %v1209_v26, %v1208_v27  ;;  %v1166_v37 = vpack.c.bf16 %v1219_v32, %v1218_v33 }
 0x192   :  { %v1212_v31 = vpop.permute.xlu0 %1211  ;;  %v591_v39 = vpop.permute.xlu1 %590 }
 0x193   :  { %v1214_v34 = vunpack.i.h.bf16 %v1212_v31  ;;  %v1213_v35 = vunpack.i.l.bf16 %v1212_v31  ;;  %1148 = vmatprep.subr.msk.bf16.mxu1 %vm1489_vm2, %v1146_v30 }
 0x194   :  { %1151 = vmatpush3.bf16.xpose.msk.msra.mxu1 %vm1489_vm2, %v1146_v30 }
 0x195   :  { %v1156_v36 = vpack.c.bf16 %v1214_v34, %v1213_v35 }
 0x196   :  { %v387_v38 = vpop.permute.xlu0 %386  ;;  %v165_v49 = vpop.permute.xlu1 %164 }
 0x197   :  { %1158 = vmatprep.subr.msk.bf16.mxu0 %vm1489_vm2, %v1156_v36  ;;  %v171_v51 = vsel %vm170_vm1, %v160_v22, %v165_v49 }
 0x198   :  { %1161 = vmatpush3.bf16.xpose.msk.msra.mxu0 %vm1489_vm2, %v1156_v36  ;;  %vm173_vm7 = vcmp.ne.f32.partialorder %v171_v51, 0.0 }
 0x199   :  { %1168 = vmatprep.subr.msk.bf16.mxu0 %vm1489_vm2, %v1166_v37  ;;  %vm175_vm9 = vmand %vm158_vm6, %vm173_vm7 }
 0x19a   :  { %v593_v40 = vpop.permute.xlu0 %592  ;;  %v1516_v58 = vsel %vm175_vm9, 0.0, %v1379_v52 }
 0x19b   :  { %1087 = vmatmul.mubr.msk.f32.vlgmr.msra.gmra.mrb[0].mxu1 %vm170_vm1, %v1463_v17 }
 0x19e   :  { %v167_v45 = vpop.permute.xlu0 %166 }
 0x19f   :  { %1101 = vmatmul.mubr.msk.f32.vlgmr.msra.gmra.mrb[4].mxu0 %vm170_vm1, %v387_v38  ;;  %v172_v48 = vsel %vm170_vm1, %v161_v23, %v167_v45 }
 0x1a0   :  { %1171 = vmatpush3.bf16.xpose.msk.msra.mxu0 %vm1489_vm2, %v1166_v37  ;;  %1114 = vmatprep.mubr.msk.f32.mxu0 %vm170_vm1, %v591_v39  ;;  %vm174_vm4 = vcmp.ne.f32.partialorder %v172_v48, 0.0 }
 0x1a1   :  { %vm176_vm5 = vmand %vm159_vm3, %vm174_vm4 }
 0x1a2   :  { %v1512_v53 = vsel %vm176_vm5, 0.0, %v1379_v52 }
 0x1a7   :  { %1115 = vmatmul.mubr.msk.f32.vlgmr.msra.gmra.mrb[6].mxu0 %vm170_vm1, %v593_v40 }
 0x26e   :  { %v1088_v54 = vpop.f32.mrb[0].mxu1 }
 0x26f   :  { %v265_v55 = vadd.f32 %v1088_v54, %v1512_v53  ;;  %v259_v56 = vpop.f32.mrb[1].mxu1 }
 0x270   :  { %v260_v63 = vadd.f32 %v259_v56, %v1516_v58 }
 0x271   :  { %v272_v57 = vsel %vm268_vm8, %v265_v55, -inf }
 0x272   :  { %273 = vmax.xlane.f32.xlu0 %v272_v57  ;;  %v1102_v59 = vpop.f32.mrb[4].mxu0  ;;  %v269_v2 = vsel %vm268_vm8, %v260_v63, -inf }
 0x273   :  { %v472_v60 = vadd.f32 %v1102_v59, %v1512_v53  ;;  %v466_v61 = vpop.f32.mrb[5].mxu0 }
 0x274   :  { %v467_v62 = vadd.f32 %v466_v61, %v1516_v58 }
 0x275   :  { %v478_v0 = vsel %vm268_vm8, %v472_v60, -inf }
 0x276   :  { %479 = vmax.xlane.f32.xlu1 %v478_v0  ;;  %v475_v1 = vsel %vm268_vm8, %v467_v62, -inf }
 0x277   :  { %476 = vmax.xlane.f32.xlu0 %v475_v1 }
 0x27a   :  { %270 = vmax.xlane.f32.xlu1 %v269_v2  ;;  %v1116_v3 = vpop.f32.mrb[6].mxu0 }
 0x27b   :  { %v678_v4 = vadd.f32 %v1116_v3, %v1512_v53  ;;  %v672_v5 = vpop.f32.mrb[7].mxu0 }
 0x27c   :  { %v673_v6 = vadd.f32 %v672_v5, %v1516_v58 }
 0x27d   :  { %v684_v7 = vsel %vm268_vm8, %v678_v4, -inf }
 0x27e   :  { %685 = vmax.xlane.f32.xlu1 %v684_v7  ;;  %v681_v8 = vsel %vm268_vm8, %v673_v6, -inf }
 0x27f   :  { %682 = vmax.xlane.f32.xlu0 %v681_v8 }
 0x28f   :  { %1226 = vrot.lane.b32.xlu1 %v1469_v19, %s1380_s29 }
 0x293   :  { %1231 = vrot.lane.b32.xlu1 %v1469_v19, %s1381_s30 }
 0x295   :  { %1221 = vrot.lane.b32.xlu0 %v1469_v19, %s1382_s4 }
 0x297   :  { %792 = vrot.lane.b32.xlu1 %v1463_v17, %s1383_s5 }
 0x299   :  { %790 = vrot.lane.b32.xlu0 %v1456_v15, %s1383_s5 }
 0x2ff   :  { %v274_v9 = vpop.xlane.xlu0 %273 }
 0x300   :  { %v276_v12 = vsub.f32 %v265_v55, %v274_v9 }
 0x302   :  { %v279_v23 = vmul.f32 1.442695, %v276_v12 }
 0x303   :  { %v480_v10 = vpop.xlane.xlu1 %479 }
 0x304   :  { %v477_v11 = vpop.xlane.xlu0 %476  ;;  %v482_v24 = vsub.f32 %v472_v60, %v480_v10 }
 0x305   :  { %v481_v13 = vsub.f32 %v467_v62, %v477_v11 }
 0x306   :  { %v485_v30 = vmul.f32 1.442695, %v482_v24 }
 0x307   :  { %v271_v14 = vpop.xlane.xlu1 %270  ;;  %v483_v26 = vmul.f32 1.442695, %v481_v13 }
 0x308   :  { %v275_v22 = vsub.f32 %v260_v63, %v271_v14 }
 0x30a   :  { %v277_v25 = vmul.f32 1.442695, %v275_v22 }
 0x30b   :  { %v686_v27 = vpop.xlane.xlu1 %685 }
 0x30c   :  { %1240 = vpow2.f32 %v277_v25  ;;  %v683_v28 = vpop.xlane.xlu0 %682  ;;  %v688_v17 = vsub.f32 %v678_v4, %v686_v27 }
 0x30d   :  { %v687_v19 = vsub.f32 %v673_v6, %v683_v28  ;;  %1242 = vpow2.f32 %v279_v23 }
 0x30e   :  { %1244 = vpow2.f32 %v483_v26  ;;  %v691_v37 = vmul.f32 1.442695, %v688_v17 }
 0x30f   :  { %v689_v15 = vmul.f32 1.442695, %v687_v19  ;;  %v1227_v31 = vpop.permute.xlu1 %1226  ;;  %1246 = vpow2.f32 %v485_v30 }
 0x310   :  { %v1222_v32 = vpop.permute.xlu0 %1221  ;;  %v1229_v33 = vunpack.i.h.bf16 %v1227_v31  ;;  %v1228_v34 = vunpack.i.l.bf16 %v1227_v31 }
 0x311   :  { %v1224_v35 = vunpack.i.h.bf16 %v1222_v32  ;;  %v1223_v36 = vunpack.i.l.bf16 %v1222_v32  ;;  %1248 = vpow2.f32 %v689_v15 }
 0x312   :  { %v1162_v39 = vpack.c.bf16 %v1229_v33, %v1228_v34  ;;  %1250 = vpow2.f32 %v691_v37 }
 0x313   :  { %v1152_v38 = vpack.c.bf16 %v1224_v35, %v1223_v36  ;;  %v1232_v41 = vpop.permute.xlu1 %1231 }
 0x314   :  { %v1234_v44 = vunpack.i.h.bf16 %v1232_v41  ;;  %v1233_v45 = vunpack.i.l.bf16 %v1232_v41  ;;  %v791_v50 = vpop.permute.xlu0 %790 }
 0x315   :  { %1153 = vmatprep.subr.bf16.mxu1 %v1152_v38 }
 0x316   :  { %v1241_v40 = vpop.eup %1240  ;;  %1155 = vmatpush3.bf16.msra.mxu1 %v1152_v38  ;;  %v1176_v48 = vpack.c.bf16 %v1234_v44, %v1233_v45 }
 0x317   :  { %1093 = vmatprep.mubr.msk.f32.mxu1 %vm268_vm8, %v1241_v40  ;;  %1163 = vmatprep.subr.bf16.mxu1 %v1162_v39  ;;  %v1243_v42 = vpop.eup %1242  ;;  %v793_v51 = vpop.permute.xlu1 %792  ;;  %v281_v0 = vsel %vm268_vm8, %v1241_v40, 0.0 }
 0x318   :  { %v1245_v43 = vpop.eup %1244  ;;  %v284_v1 = vsel %vm268_vm8, %v1243_v42, 0.0 }
 0x319   :  { %1094 = vmatmul.mubr.msk.f32.vlgmr.msra.gmra.mrb[2].mxu1 %vm268_vm8, %v1243_v42  ;;  %v1247_v46 = vpop.eup %1246  ;;  %v487_v2 = vsel %vm268_vm8, %v1245_v43, 0.0 }
 0x31a   :  { %1165 = vmatpush3.bf16.msra.mxu1 %v1162_v39  ;;  %1107 = vmatprep.mubr.msk.f32.mxu1 %vm268_vm8, %v1245_v43 }
 0x31b   :  { %1173 = vmatprep.subr.bf16.mxu1 %v1475_v21  ;;  %v1249_v47 = vpop.eup %1248 }
 0x31c   :  { %v1251_v49 = vpop.eup %1250 }
 0x31d   :  { %1108 = vmatmul.mubr.msk.f32.vlgmr.msra.gmra.mrb[4].mxu1 %vm268_vm8, %v1247_v46  ;;  %v696_v3 = vsel %vm268_vm8, %v1251_v49, 0.0 }
 0x31e   :  { %1175 = vmatpush3.bf16.msra.mxu1 %v1475_v21  ;;  %1121 = vmatprep.mubr.msk.f32.mxu1 %vm268_vm8, %v1249_v47 }
 0x31f   :  { %1178 = vmatprep.subr.msk.bf16.mxu1 %vm1489_vm2, %v1176_v48 }
 0x321   :  { %1122 = vmatmul.mubr.msk.f32.vlgmr.msra.gmra.mrb[6].mxu1 %vm268_vm8, %v1251_v49 }
 0x322   :  { %1128 = vmatprep.mubr.msk.f32.mxu1 %vm170_vm1, %v791_v50 }
 0x327   :  { %1181 = vmatpush3.bf16.xpose.msk.msra.mxu1 %vm1489_vm2, %v1176_v48 }
 0x32e   :  { %1129 = vmatmul.mubr.msk.f32.vlgmr.msra.gmra.mrb[8].mxu1 %vm170_vm1, %v793_v51 }
 0x3ec   :  { %v1547_v52 = vpop.f32.mrb[2].mxu1 }
 0x3ed   :  { %v1549_v21 = vpop.f32.mrb[3].mxu1 }
 0x3f0   :  { %v1551_v54 = vpop.f32.mrb[4].mxu1 }
 0x3f1   :  { %v1553_v55 = vpop.f32.mrb[5].mxu1 }
 0x3f4   :  { %v1555_v56 = vpop.f32.mrb[6].mxu1 }
 0x3f5   :  { %v1557_v57 = vpop.f32.mrb[7].mxu1 }
 0x401   :  { %v1130_v59 = vpop.f32.mrb[8].mxu1 }
 0x402   :  { %v878_v60 = vadd.f32 %v1130_v59, %v1512_v53  ;;  %v872_v29 = vpop.f32.mrb[9].mxu1  ;;  %v490_v53 = vsel %vm268_vm8, %v1247_v46, 0.0 }
 0x403   :  { %v873_v61 = vadd.f32 %v872_v29, %v1516_v58  ;;  %v693_v58 = vsel %vm268_vm8, %v1249_v47, 0.0 }
 0x404   :  { %v884_v62 = vsel %vm268_vm8, %v878_v60, -inf }
 0x405   :  { %885 = vmax.xlane.f32.xlu1 %v884_v62  ;;  %v881_v63 = vsel %vm268_vm8, %v873_v61, -inf }
 0x406   :  { %882 = vmax.xlane.f32.xlu0 %v881_v63 }
 0x409   :  { %282 = vadd.xlane.f32.xlu1 %v281_v0 }
 0x40d   :  { %285 = vadd.xlane.f32.xlu1 %v284_v1 }
 0x411   :  { %488 = vadd.xlane.f32.xlu1 %v487_v2 }
 0x415   :  { %491 = vadd.xlane.f32.xlu1 %v490_v53 }
 0x419   :  { %694 = vadd.xlane.f32.xlu1 %v693_v58 }
 0x41c   :  { %1236 = vrot.lane.b32.xlu0 %v1235_v20, %s1376_s26 }
 0x43b   :  { %697 = vadd.xlane.f32.xlu0 %v696_v3 }
 0x492   :  { %v886_v4 = vpop.xlane.xlu1 %885 }
 0x493   :  { %v888_v5 = vsub.f32 %v878_v60, %v886_v4  ;;  %v883_v6 = vpop.xlane.xlu0 %882 }
 0x494   :  { %v887_v7 = vsub.f32 %v873_v61, %v883_v6 }
 0x495   :  { %v891_v8 = vmul.f32 1.442695, %v888_v5 }
 0x496   :  { %v889_v9 = vmul.f32 1.442695, %v887_v7  ;;  %v283_v10 = vpop.xlane.xlu1 %282 }
 0x497   :  { %1252 = vpow2.f32 %v891_v8  ;;  %v1237_v11 = vpop.permute.xlu0 %1236 }
 0x498   :  { %1254 = vpow2.f32 %v889_v9  ;;  %v1239_v12 = vunpack.i.h.bf16 %v1237_v11  ;;  %v1238_v13 = vunpack.i.l.bf16 %v1237_v11 }
 0x499   :  { %1256 = vrcp.f32 %v283_v10 }
 0x49a   :  { %v1182_v14 = vpack.c.bf16 %v1239_v12, %v1238_v13  ;;  %v286_v22 = vpop.xlane.xlu1 %285 }
 0x49b   :  { %1258 = vrcp.f32 %v286_v22 }
 0x49c   :  { %1183 = vmatprep.subr.bf16.mxu0 %v1182_v14 }
 0x49d   :  { %1185 = vmatpush3.bf16.msra.mxu0 %v1182_v14 }
 0x49e   :  { %v489_v16 = vpop.xlane.xlu1 %488 }
 0x49f   :  { %1260 = vrcp.f32 %v489_v16 }
 0x4a1   :  { %v1253_v18 = vpop.eup %1252 }
 0x4a2   :  { %v1255_v20 = vpop.eup %1254  ;;  %v492_v23 = vpop.xlane.xlu1 %491  ;;  %v896_v28 = vsel %vm268_vm8, %v1253_v18, 0.0 }
 0x4a3   :  { %v1257_v24 = vpop.eup %1256  ;;  %1262 = vrcp.f32 %v492_v23  ;;  %1135 = vmatprep.mubr.msk.f32.mxu0 %vm268_vm8, %v1255_v20  ;;  %v893_v25 = vsel %vm268_vm8, %v1255_v20, 0.0 }
 0x4a4   :  { %v289_v26 = vmul.f32 %v1257_v24, %v283_v10  ;;  %894 = vadd.xlane.f32.xlu1 %v893_v25  ;;  %1136 = vmatmul.mubr.msk.f32.vlgmr.msra.gmra.mrb[8].mxu0 %vm268_vm8, %v1253_v18 }
 0x4a5   :  { %v1259_v27 = vpop.eup %1258 }
 0x4a6   :  { %v291_v19 = vsub.f32 2.0, %v289_v26  ;;  %v290_v30 = vmul.f32 %v1259_v27, %v286_v22  ;;  %v695_v46 = vpop.xlane.xlu1 %694 }
 0x4a8   :  { %897 = vadd.xlane.f32.xlu1 %v896_v28  ;;  %v293_v31 = vmul.f32 %v1257_v24, %v291_v19  ;;  %v292_v32 = vsub.f32 2.0, %v290_v30 }
 0x4a9   :  { %v1261_v17 = vpop.eup %1260 }
 0x4aa   :  { %v495_v15 = vmul.f32 %v1261_v17, %v489_v16  ;;  %v382_v37 = vmul.f32 %v1549_v21, %v293_v31  ;;  %v294_v38 = vmul.f32 %v1259_v27, %v292_v32 }
 0x4ac   :  { %v497_v33 = vsub.f32 2.0, %v495_v15  ;;  %v383_v43 = vmul.f32 %v1547_v52, %v294_v38 }
 0x4ad   :  { %v1263_v34 = vpop.eup %1262 }
 0x4ae   :  { %v499_v35 = vmul.f32 %v1261_v17, %v497_v33  ;;  %v496_v36 = vmul.f32 %v1263_v34, %v492_v23 }
 0x4b0   :  { %v588_v39 = vmul.f32 %v1553_v55, %v499_v35  ;;  %v498_v40 = vsub.f32 2.0, %v496_v36 }
 0x4b2   :  { %v500_v41 = vmul.f32 %v1263_v34, %v498_v40  ;;  %v998_v42 = vadd.f32 %v588_v39, %v382_v37 }
 0x4b4   :  { %v589_v44 = vmul.f32 %v1551_v54, %v500_v41 }
 0x4b6   :  { %v999_v45 = vadd.f32 %v589_v44, %v383_v43 }
 0x4c8   :  { %v698_v48 = vpop.xlane.xlu0 %697 }
 0x4c9   :  { %1264 = vrcp.f32 %v698_v48 }
 0x4ca   :  { %1266 = vrcp.f32 %v695_v46 }
 0x4d3   :  { %v1265_v50 = vpop.eup %1264 }
 0x4d4   :  { %v1267_v51 = vpop.eup %1266  ;;  %v702_v59 = vmul.f32 %v1265_v50, %v698_v48 }
 0x4d5   :  { %v701_v60 = vmul.f32 %v1267_v51, %v695_v46 }
 0x4d6   :  { %v704_v52 = vsub.f32 2.0, %v702_v59 }
 0x4d7   :  { %v703_v62 = vsub.f32 2.0, %v701_v60 }
 0x4d8   :  { %v706_v0 = vmul.f32 %v1265_v50, %v704_v52 }
 0x4d9   :  { %v705_v1 = vmul.f32 %v1267_v51, %v703_v62 }
 0x4da   :  { %v789_v3 = vmul.f32 %v1555_v56, %v706_v0 }
 0x4db   :  { %v788_v6 = vmul.f32 %v1557_v57, %v705_v1 }
 0x531   :  { %v895_v47 = vpop.xlane.xlu1 %894 }
 0x535   :  { %v898_v49 = vpop.xlane.xlu1 %897 }
 0x536   :  { %1268 = vrcp.f32 %v898_v49 }
 0x537   :  { %1270 = vrcp.f32 %v895_v47 }
 0x540   :  { %v1269_v21 = vpop.eup %1268 }
 0x541   :  { %v1271_v55 = vpop.eup %1270  ;;  %v902_v29 = vmul.f32 %v1269_v21, %v898_v49 }
 0x542   :  { %v901_v61 = vmul.f32 %v1271_v55, %v895_v47 }
 0x543   :  { %v904_v54 = vsub.f32 2.0, %v902_v29 }
 0x544   :  { %v903_v63 = vsub.f32 2.0, %v901_v61 }
 0x545   :  { %v906_v2 = vmul.f32 %v1269_v21, %v904_v54 }
 0x546   :  { %v905_v58 = vmul.f32 %v1271_v55, %v903_v63 }
 0x577   :  { %v1137_v53 = vpop.f32.mrb[8].mxu0 }
 0x578   :  { %v997_v4 = vmul.f32 %v1137_v53, %v906_v2  ;;  %v987_v5 = vpop.f32.mrb[9].mxu0 }
 0x579   :  { %v996_v7 = vmul.f32 %v987_v5, %v905_v58 }
 0x57a   :  { %v1001_v8 = vadd.f32 %v997_v4, %v789_v3 }
 0x57b   :  { %v1000_v9 = vadd.f32 %v996_v7, %v788_v6 }
 0x57c   :  { %v1003_v10 = vadd.f32 %v1001_v8, %v999_v45 }
 0x57d   :  { %v1002_v11 = vadd.f32 %v1000_v9, %v998_v42 }
 0x57e   :  { %1005 = vst.msk [vmem:[#allocation8 + $0x8] sm:$0xff] %vm66_vm0, %v1003_v10 }
 0x57f   :  { %1004 = vst.msk [vmem:[#allocation8] sm:$0xff] %vm66_vm0, %v1002_v11 }
 0x580   :  { %1349 = shalt.err (!%p1346_p0)
}
 0x581   :  { %s1350_s10 = scalar_lea.hbm %s1603_s3, 256 }
 0x582   :  { %p1351_p1 = scmp.ne.s32.totalorder %s1603_s3, %s1350_s10  ;;  %p1354_p2 = scmp.lt.u32.totalorder %s1350_s10, %s1603_s3 }
 0x584   :  { %p1356_p3 = pnand %p1354_p2, %p1351_p1 }
 0x586   :  { %1359 = shalt.err (!%p1356_p3)
}
 0x587   :  { %1017 = dma.vmem_to_hbm [thread:$0]  %s1012_s7, 256, %s1603_s3, [#allocation4], %s1368_s24, %s1368_s24, %s1369_s25  }
 0x588   :  { %1364 = dma.done.wait [#allocation4], 256  }
 0x589   :  { %1365 = vsyncadd [#allocation4], 4294967040 }
 0x58a   :  { %1021 = vsyncpa [#allocation3], 1 }
 0x58b   :  { %1022 = vsyncpa [#allocation6], 1 }
 0x58c   :  { %1023 = vsyncpa [#allocation4], 1 }

</bundles_post_ra>
